<compile_context>
chip_gen: v7x
topology: tpu7x:2x2x1
jax: 0.10.0
libtpu: 0.0.40
codegen_flags: <defaults>
</compile_context>

<pallas_src>
import jax
import jax.numpy as jnp
from jax.experimental import pallas as pl
from jax.experimental.pallas import tpu as pltpu

LANE = 128          # lane width of the packed-parameter / output slabs
NEG_PAD = -1e30     # bias value for padded logit lanes (killed by log-softmax)


def _round_up(x, m):
    return -(-x // m) * m


# --------------------------------------------------------------------------------------
# Parameter packing: one bf16 weight slab + one f32 bias slab, each [rows, 128],
# every tensor in a sublane-tile-aligned sub-slab (16 rows for bf16, 8 for f32).
# --------------------------------------------------------------------------------------
def build_packed_params(params):
    num_classes = params["fc2_w"].shape[1]

    w_items = [("w1", params["w1"]), ("w2", params["w2"]), ("w3", params["w3"]),
               ("fc1_w", params["fc1_w"]), ("fc2_w", params["fc2_w"])]
    b_items = [("b1", params["b1"]), ("b2", params["b2"]), ("b3", params["b3"]),
               ("fc1_b", params["fc1_b"]), ("fc2_b", params["fc2_b"])]

    woff, row = {}, 0
    for name, arr in w_items:
        assert arr.shape[1] <= LANE
        woff[name] = row
        row += _round_up(arr.shape[0], 16)        # bf16 sublane tile = 16
    w_rows = row
    pw = jnp.zeros((w_rows, LANE), jnp.bfloat16)
    for name, arr in w_items:
        r, c = arr.shape
        pw = pw.at[woff[name]:woff[name] + r, 0:c].set(arr.astype(jnp.bfloat16))
    # fc2 output is padded to LANE classes: pad weight columns stay zero.

    boff, row = {}, 0
    for name, _ in b_items:
        boff[name] = row
        row += 8                                  # one 8-row f32 slab per bias
    b_rows = row
    pb = jnp.zeros((b_rows, LANE), jnp.float32)
    for name, arr in b_items:
        pb = pb.at[boff[name]:boff[name] + 1, 0:arr.shape[1]].set(arr.astype(jnp.float32))
    # Padded logit lanes get a very negative bias so log-softmax ignores them.
    pb = pb.at[boff["fc2_b"], num_classes:LANE].set(NEG_PAD)

    return pw, woff, w_rows, pb, boff, b_rows


# --------------------------------------------------------------------------------------
# Kernel (one grid step = GB graphs; block-diagonal operator built in VMEM)
# --------------------------------------------------------------------------------------
def make_kernel(woff, boff, dims, GB, N):
    in_dim, h1, h2, f1, f2, _num_classes = dims
    GN = GB * N

    def kernel(s_ref, h_ref, pw_ref, pb_ref, out_ref, sbd_ref):
        # Build the block-diagonal normalized adjacency (what dgl.batch produces) from the
        # compact [GB, N, N] input: zero the scratch, then GB static slab stores.
        sbd_ref[...] = jnp.zeros_like(sbd_ref)
        for g in range(GB):                                       # unrolled at trace time
            sbd_ref[g * N:(g + 1) * N, g * N:(g + 1) * N] = s_ref[g]
        S = sbd_ref[...]                                          # [GN, GN] bf16
        H0 = h_ref[...]                                           # [GN, in_dim] bf16

        def wmat(name, fi, fo):                                   # bf16 weight view
            r = woff[name]
            return pw_ref[r:r + fi, 0:fo]

        def brow(name, fo):                                       # f32 bias row (1, fo)
            r = boff[name]
            return pb_ref[r:r + 1, 0:fo]

        def sgconv(Hb, wname, bname, fi, fo):
            # SGConv(k=1): relu( (D^-1/2 A D^-1/2) H W + b ); f32 accumulation throughout.
            P = jnp.dot(S, Hb, preferred_element_type=jnp.float32)                # propagate
            Z = jnp.dot(P.astype(jnp.bfloat16), wmat(wname, fi, fo),
                        preferred_element_type=jnp.float32)                       # transform
            return jnp.maximum(Z + brow(bname, fo), 0.0)                          # bias+ReLU

        Hc = sgconv(H0, "w1", "b1", in_dim, h1)
        Hc = sgconv(Hc.astype(jnp.bfloat16), "w2", "b2", h1, h2)
        Hc = sgconv(Hc.astype(jnp.bfloat16), "w3", "b3", h2, f1)                  # [GN, f1] f32

        # dgl.mean_nodes: per-graph mean over nodes (sublane reduction, no readout matmul).
        # TODO(synk): for padded / variable-size graphs use per-graph valid-node counts.
        hg = jnp.mean(Hc.reshape(GB, N, f1), axis=1)                              # [GB, f1]

        z = jnp.maximum(
            jnp.dot(hg.astype(jnp.bfloat16), wmat("fc1_w", f1, f2),
                    preferred_element_type=jnp.float32) + brow("fc1_b", f2), 0.0)

        # fc2 pre-padded to LANE output columns (pad weights 0, pad bias NEG_PAD).
        logits = jnp.dot(z.astype(jnp.bfloat16), wmat("fc2_w", f2, LANE),
                         preferred_element_type=jnp.float32) + brow("fc2_b", LANE)

        # LogSoftmax(dim=1); padded lanes contribute exp(-inf)=0.  torch.squeeze(.,1) is a
        # no-op for num_classes > 1.
        m = jnp.max(logits, axis=1, keepdims=True)
        e = jnp.exp(logits - m)
        out_ref[...] = logits - m - jnp.log(jnp.sum(e, axis=1, keepdims=True))

    return kernel


# --------------------------------------------------------------------------------------
# Wrapper
# --------------------------------------------------------------------------------------
def simple_graph_conv_binary_classifier(S, H, params, *, graphs_per_block=8):
    """S: [B, N, N] normalized adjacency per graph; H: [B, N, in_dim] node features.

    graphs_per_block (GB): 8 on v5e (GN=128 matches the MXU), up to 16 on v6e/v7x provided
    BT = B / GB stays >= 2 (v7x has 2 TensorCores sharing the parallel grid axis).
    """
    B, N, _ = S.shape
    in_dim = H.shape[-1]
    h1 = params["w1"].shape[1]
    h2 = params["w2"].shape[1]
    f1 = params["w3"].shape[1]
    f2 = params["fc1_w"].shape[1]
    num_classes = params["fc2_w"].shape[1]
    for d in (in_dim, h1, h2, f1, f2, num_classes):
        assert d <= LANE, "feature dims must fit the 128-lane packed slabs"

    GB = graphs_per_block
    assert B % GB == 0, "demo assumes the batch divides the graphs-per-block tile"
    assert GB % 8 == 0 and (GB * N) % 8 == 0
    BT = B // GB
    GN = GB * N

    pw, woff, w_rows, pb, boff, b_rows = build_packed_params(params)

    # Compact bf16 inputs: no zero-inflated block-diagonal over HBM (built in VMEM in-kernel),
    # and no extra wrapper-side XLA materialization pass — just free reshapes + dtype cast.
    S_c = S.astype(jnp.bfloat16).reshape(BT, GB, N, N)
    H_flat = H.astype(jnp.bfloat16).reshape(B * N, in_dim)

    kernel = make_kernel(woff, boff, (in_dim, h1, h2, f1, f2, num_classes), GB, N)

    out = pl.pallas_call(
        kernel,
        out_shape=jax.ShapeDtypeStruct((B, LANE), jnp.float32),
        grid=(BT,),
        in_specs=[
            pl.BlockSpec((pl.Squeezed(), GB, N, N), lambda b: (b, 0, 0, 0)),  # compact adjacency
            pl.BlockSpec((GN, in_dim), lambda b: (b, 0)),                     # node features
            pl.BlockSpec((w_rows, LANE), lambda b: (0, 0)),                   # bf16 weights (resident)
            pl.BlockSpec((b_rows, LANE), lambda b: (0, 0)),                   # f32 biases  (resident)
        ],
        out_specs=pl.BlockSpec((GB, LANE), lambda b: (b, 0)),                 # lane-dense output slab
        scratch_shapes=[pltpu.VMEM((GN, GN), jnp.bfloat16)],                  # block-diag operator
        compiler_params=pltpu.CompilerParams(
            dimension_semantics=("parallel",),                                # megacore / v7x 2-TC split
        ),
    )(S_c, H_flat, pw, pb)

    return out[:, :num_classes]


# --------------------------------------------------------------------------------------
# Pure-JAX f32 reference of the same forward pass (correctness check)
# --------------------------------------------------------------------------------------
def _reference(S, H, params):
    def sg(h, w, b):
        return jnp.maximum(jnp.einsum("bij,bjf->bif", S, h) @ w + b, 0.0)

    h = sg(H, params["w1"], params["b1"])
    h = sg(h, params["w2"], params["b2"])
    h = sg(h, params["w3"], params["b3"])
    hg = jnp.mean(h, axis=1)                                     # dgl.mean_nodes
    z = jnp.maximum(hg @ params["fc1_w"] + params["fc1_b"], 0.0)
    z = z @ params["fc2_w"] + params["fc2_b"]
    return jax.nn.log_softmax(z, axis=1)


if __name__ == "__main__":
    key = jax.random.PRNGKey(0)
    B, N = 16, 16                                   # 16 graphs, 16 nodes each
    in_dim, hidden1, hidden2 = 8, 32, 32
    fc_hidden1, fc_hidden2, num_classes = 32, 32, 2
    ks = jax.random.split(key, 12)

    # Deterministic random undirected graphs (dense adjacency, no self loops).
    a = (jax.random.uniform(ks[0], (B, N, N)) < 0.3).astype(jnp.float32)
    a = jnp.maximum(a, jnp.swapaxes(a, 1, 2)) * (1.0 - jnp.eye(N, dtype=jnp.float32))
    # DGL SGConv normalization: D^{-1/2} A D^{-1/2} with degree clamp(min=1).
    # TODO(synk): DGL SGConv expects the caller to add self-loops for zero-in-degree nodes;
    # we only apply its internal clamp(min=1), matching the math stated above.
    deg = jnp.maximum(jnp.sum(a, axis=2), 1.0)
    dis = 1.0 / jnp.sqrt(deg)
    S = dis[:, :, None] * a * dis[:, None, :]

    H = jax.random.normal(ks[1], (B, N, in_dim), jnp.float32)

    def init_linear(kw, kb, fi, fo):
        return (0.1 * jax.random.normal(kw, (fi, fo), jnp.float32),
                0.1 * jax.random.normal(kb, (1, fo), jnp.float32))

    w1, b1 = init_linear(ks[2], ks[3], in_dim, hidden1)          # SGConv(in_dim, h1)
    w2, b2 = init_linear(ks[4], ks[5], hidden1, hidden2)         # SGConv(h1, h2)
    w3, b3 = init_linear(ks[6], ks[7], hidden2, fc_hidden1)      # SGConv(h2, fc_h1)
    fc1_w, fc1_b = init_linear(ks[8], ks[9], fc_hidden1, fc_hidden2)     # fc_1
    fc2_w, fc2_b = init_linear(ks[10], ks[11], fc_hidden2, num_classes)  # fc_2

    params = dict(w1=w1, b1=b1, w2=w2, b2=b2, w3=w3, b3=b3,
                  fc1_w=fc1_w, fc1_b=fc1_b, fc2_w=fc2_w, fc2_b=fc2_b)

    out = simple_graph_conv_binary_classifier(S, H, params, graphs_per_block=8)
    out = jax.block_until_ready(out)

    ref = _reference(S, H, params)
    assert out.shape == (B, num_classes)
    assert bool(jnp.all(jnp.isfinite(out)))
    # bf16 MXU operands (f32 accumulation) vs. full-f32 reference -> loose-ish tolerance.
    assert jnp.allclose(out, ref, atol=2e-2, rtol=2e-2), (out, ref)
    print("KERNEL_OK")
</pallas_src>

<mosaic_0001>
module attributes {stable_mosaic.version = 11 : i64} {
  func.func @kernel(%arg0: i32, %arg1: memref<1x8x16x16xbf16, #tpu.memory_space<vmem>>, %arg2: memref<128x8xbf16, #tpu.memory_space<vmem>>, %arg3: memref<144x128xbf16, #tpu.memory_space<vmem>>, %arg4: memref<40x128xf32, #tpu.memory_space<vmem>>, %arg5: memref<8x128xf32, #tpu.memory_space<vmem>>, %arg6: memref<128x128xbf16, #tpu.memory_space<vmem>>) attributes {dimension_semantics = [#tpu.dimension_semantics<parallel>], iteration_bounds = array<i64: 2>, scalar_prefetch = 0 : i64, scratch_operands = 1 : i64, tpu.core_type = #tpu.core_type<tc>, window_params = [{transform_indices = @transform_0, window_bounds = array<i64: 1, 8, 16, 16>}, {transform_indices = @transform_1, window_bounds = array<i64: 128, 8>}, {pipeline_mode = #tpu.pipeline_mode<synchronous>, transform_indices = @transform_2, window_bounds = array<i64: 144, 128>}, {pipeline_mode = #tpu.pipeline_mode<synchronous>, transform_indices = @transform_3, window_bounds = array<i64: 40, 128>}, {transform_indices = @transform_4, window_bounds = array<i64: 8, 128>}]} {
    %cst = arith.constant 0.000000e+00 : bf16
    %0 = vector.broadcast %cst : bf16 to vector<128x128xbf16>
    %c0 = arith.constant 0 : index
    %c0_0 = arith.constant 0 : index
    %1 = vector.load %arg6[%c0, %c0_0] : memref<128x128xbf16, #tpu.memory_space<vmem>>, vector<128x128xbf16>
    tpu.vector_store %arg6[%c0, %c0_0], %0 {strides = array<i32>} : memref<128x128xbf16, #tpu.memory_space<vmem>>, vector<128x128xbf16>,
    %c0_1 = arith.constant 0 : index
    %c0_2 = arith.constant 0 : index
    %c0_3 = arith.constant 0 : index
    %c0_4 = arith.constant 0 : index
    %2 = vector.load %arg1[%c0_1, %c0_2, %c0_3, %c0_4] : memref<1x8x16x16xbf16, #tpu.memory_space<vmem>>, vector<1x1x16x16xbf16>
    %3 = vector.shape_cast %2 : vector<1x1x16x16xbf16> to vector<16x16xbf16>
    %c0_5 = arith.constant 0 : index
    %c0_6 = arith.constant 0 : index
    %4 = vector.load %arg6[%c0_5, %c0_6] : memref<128x128xbf16, #tpu.memory_space<vmem>>, vector<16x16xbf16>
    tpu.vector_store %arg6[%c0_5, %c0_6], %3 {strides = array<i32>} : memref<128x128xbf16, #tpu.memory_space<vmem>>, vector<16x16xbf16>,
    %c0_7 = arith.constant 0 : index
    %c1 = arith.constant 1 : index
    %c0_8 = arith.constant 0 : index
    %c0_9 = arith.constant 0 : index
    %5 = vector.load %arg1[%c0_7, %c1, %c0_8, %c0_9] : memref<1x8x16x16xbf16, #tpu.memory_space<vmem>>, vector<1x1x16x16xbf16>
    %6 = vector.shape_cast %5 : vector<1x1x16x16xbf16> to vector<16x16xbf16>
    %c16 = arith.constant 16 : index
    %c16_10 = arith.constant 16 : index
    %7 = vector.load %arg6[%c16, %c16_10] : memref<128x128xbf16, #tpu.memory_space<vmem>>, vector<16x16xbf16>
    tpu.vector_store %arg6[%c16, %c16_10], %6 {strides = array<i32>} : memref<128x128xbf16, #tpu.memory_space<vmem>>, vector<16x16xbf16>,
    %c0_11 = arith.constant 0 : index
    %c2 = arith.constant 2 : index
    %c0_12 = arith.constant 0 : index
    %c0_13 = arith.constant 0 : index
    %8 = vector.load %arg1[%c0_11, %c2, %c0_12, %c0_13] : memref<1x8x16x16xbf16, #tpu.memory_space<vmem>>, vector<1x1x16x16xbf16>
    %9 = vector.shape_cast %8 : vector<1x1x16x16xbf16> to vector<16x16xbf16>
    %c32 = arith.constant 32 : index
    %c32_14 = arith.constant 32 : index
    %10 = vector.load %arg6[%c32, %c32_14] : memref<128x128xbf16, #tpu.memory_space<vmem>>, vector<16x16xbf16>
    tpu.vector_store %arg6[%c32, %c32_14], %9 {strides = array<i32>} : memref<128x128xbf16, #tpu.memory_space<vmem>>, vector<16x16xbf16>,
    %c0_15 = arith.constant 0 : index
    %c3 = arith.constant 3 : index
    %c0_16 = arith.constant 0 : index
    %c0_17 = arith.constant 0 : index
    %11 = vector.load %arg1[%c0_15, %c3, %c0_16, %c0_17] : memref<1x8x16x16xbf16, #tpu.memory_space<vmem>>, vector<1x1x16x16xbf16>
    %12 = vector.shape_cast %11 : vector<1x1x16x16xbf16> to vector<16x16xbf16>
    %c48 = arith.constant 48 : index
    %c48_18 = arith.constant 48 : index
    %13 = vector.load %arg6[%c48, %c48_18] : memref<128x128xbf16, #tpu.memory_space<vmem>>, vector<16x16xbf16>
    tpu.vector_store %arg6[%c48, %c48_18], %12 {strides = array<i32>} : memref<128x128xbf16, #tpu.memory_space<vmem>>, vector<16x16xbf16>,
    %c0_19 = arith.constant 0 : index
    %c4 = arith.constant 4 : index
    %c0_20 = arith.constant 0 : index
    %c0_21 = arith.constant 0 : index
    %14 = vector.load %arg1[%c0_19, %c4, %c0_20, %c0_21] : memref<1x8x16x16xbf16, #tpu.memory_space<vmem>>, vector<1x1x16x16xbf16>
    %15 = vector.shape_cast %14 : vector<1x1x16x16xbf16> to vector<16x16xbf16>
    %c64 = arith.constant 64 : index
    %c64_22 = arith.constant 64 : index
    %16 = vector.load %arg6[%c64, %c64_22] : memref<128x128xbf16, #tpu.memory_space<vmem>>, vector<16x16xbf16>
    tpu.vector_store %arg6[%c64, %c64_22], %15 {strides = array<i32>} : memref<128x128xbf16, #tpu.memory_space<vmem>>, vector<16x16xbf16>,
    %c0_23 = arith.constant 0 : index
    %c5 = arith.constant 5 : index
    %c0_24 = arith.constant 0 : index
    %c0_25 = arith.constant 0 : index
    %17 = vector.load %arg1[%c0_23, %c5, %c0_24, %c0_25] : memref<1x8x16x16xbf16, #tpu.memory_space<vmem>>, vector<1x1x16x16xbf16>
    %18 = vector.shape_cast %17 : vector<1x1x16x16xbf16> to vector<16x16xbf16>
    %c80 = arith.constant 80 : index
    %c80_26 = arith.constant 80 : index
    %19 = vector.load %arg6[%c80, %c80_26] : memref<128x128xbf16, #tpu.memory_space<vmem>>, vector<16x16xbf16>
    tpu.vector_store %arg6[%c80, %c80_26], %18 {strides = array<i32>} : memref<128x128xbf16, #tpu.memory_space<vmem>>, vector<16x16xbf16>,
    %c0_27 = arith.constant 0 : index
    %c6 = arith.constant 6 : index
    %c0_28 = arith.constant 0 : index
    %c0_29 = arith.constant 0 : index
    %20 = vector.load %arg1[%c0_27, %c6, %c0_28, %c0_29] : memref<1x8x16x16xbf16, #tpu.memory_space<vmem>>, vector<1x1x16x16xbf16>
    %21 = vector.shape_cast %20 : vector<1x1x16x16xbf16> to vector<16x16xbf16>
    %c96 = arith.constant 96 : index
    %c96_30 = arith.constant 96 : index
    %22 = vector.load %arg6[%c96, %c96_30] : memref<128x128xbf16, #tpu.memory_space<vmem>>, vector<16x16xbf16>
    tpu.vector_store %arg6[%c96, %c96_30], %21 {strides = array<i32>} : memref<128x128xbf16, #tpu.memory_space<vmem>>, vector<16x16xbf16>,
    %c0_31 = arith.constant 0 : index
    %c7 = arith.constant 7 : index
    %c0_32 = arith.constant 0 : index
    %c0_33 = arith.constant 0 : index
    %23 = vector.load %arg1[%c0_31, %c7, %c0_32, %c0_33] : memref<1x8x16x16xbf16, #tpu.memory_space<vmem>>, vector<1x1x16x16xbf16>
    %24 = vector.shape_cast %23 : vector<1x1x16x16xbf16> to vector<16x16xbf16>
    %c112 = arith.constant 112 : index
    %c112_34 = arith.constant 112 : index
    %25 = vector.load %arg6[%c112, %c112_34] : memref<128x128xbf16, #tpu.memory_space<vmem>>, vector<16x16xbf16>
    tpu.vector_store %arg6[%c112, %c112_34], %24 {strides = array<i32>} : memref<128x128xbf16, #tpu.memory_space<vmem>>, vector<16x16xbf16>,
    %c0_35 = arith.constant 0 : index
    %c0_36 = arith.constant 0 : index
    %26 = vector.load %arg6[%c0_35, %c0_36] : memref<128x128xbf16, #tpu.memory_space<vmem>>, vector<128x128xbf16>
    %c0_37 = arith.constant 0 : index
    %c0_38 = arith.constant 0 : index
    %27 = vector.load %arg2[%c0_37, %c0_38] : memref<128x8xbf16, #tpu.memory_space<vmem>>, vector<128x8xbf16>
    %cst_39 = arith.constant dense<0.000000e+00> : vector<128x8xf32>
    %28 = tpu.matmul %26, %27, %cst_39 {dimension_numbers = #tpu.dot_dimension_numbers<[1], [0], [0], [1], [0, 0, 1, 1], [], []>} : vector<128x128xbf16>, vector<128x8xbf16>, vector<128x8xf32> -> vector<128x8xf32>
    %29 = arith.truncf %28 : vector<128x8xf32> to vector<128x8xbf16>
    %c0_40 = arith.constant 0 : index
    %c0_41 = arith.constant 0 : index
    %30 = vector.load %arg3[%c0_40, %c0_41] : memref<144x128xbf16, #tpu.memory_space<vmem>>, vector<8x32xbf16>
    %cst_42 = arith.constant dense<0.000000e+00> : vector<128x32xf32>
    %31 = tpu.matmul %29, %30, %cst_42 {dimension_numbers = #tpu.dot_dimension_numbers<[1], [0], [0], [1], [0, 0, 1, 1], [], []>} : vector<128x8xbf16>, vector<8x32xbf16>, vector<128x32xf32> -> vector<128x32xf32>
    %c0_43 = arith.constant 0 : index
    %c0_44 = arith.constant 0 : index
    %32 = vector.load %arg4[%c0_43, %c0_44] : memref<40x128xf32, #tpu.memory_space<vmem>>, vector<1x32xf32>
    %33 = vector.broadcast %32 : vector<1x32xf32> to vector<128x32xf32>
    %34 = arith.addf %31, %33 : vector<128x32xf32>
    %cst_45 = arith.constant 0.000000e+00 : f32
    %35 = vector.broadcast %cst_45 : f32 to vector<128x32xf32>
    %36 = arith.maximumf %34, %35 : vector<128x32xf32>
    %37 = arith.truncf %36 : vector<128x32xf32> to vector<128x32xbf16>
    %cst_46 = arith.constant dense<0.000000e+00> : vector<128x32xf32>
    %38 = tpu.matmul %26, %37, %cst_46 {dimension_numbers = #tpu.dot_dimension_numbers<[1], [0], [0], [1], [0, 0, 1, 1], [], []>} : vector<128x128xbf16>, vector<128x32xbf16>, vector<128x32xf32> -> vector<128x32xf32>
    %39 = arith.truncf %38 : vector<128x32xf32> to vector<128x32xbf16>
    %c16_47 = arith.constant 16 : index
    %c0_48 = arith.constant 0 : index
    %40 = vector.load %arg3[%c16_47, %c0_48] : memref<144x128xbf16, #tpu.memory_space<vmem>>, vector<32x32xbf16>
    %cst_49 = arith.constant dense<0.000000e+00> : vector<128x32xf32>
    %41 = tpu.matmul %39, %40, %cst_49 {dimension_numbers = #tpu.dot_dimension_numbers<[1], [0], [0], [1], [0, 0, 1, 1], [], []>} : vector<128x32xbf16>, vector<32x32xbf16>, vector<128x32xf32> -> vector<128x32xf32>
    %c8 = arith.constant 8 : index
    %c0_50 = arith.constant 0 : index
    %42 = vector.load %arg4[%c8, %c0_50] : memref<40x128xf32, #tpu.memory_space<vmem>>, vector<1x32xf32>
    %43 = vector.broadcast %42 : vector<1x32xf32> to vector<128x32xf32>
    %44 = arith.addf %41, %43 : vector<128x32xf32>
    %cst_51 = arith.constant 0.000000e+00 : f32
    %45 = vector.broadcast %cst_51 : f32 to vector<128x32xf32>
    %46 = arith.maximumf %44, %45 : vector<128x32xf32>
    %47 = arith.truncf %46 : vector<128x32xf32> to vector<128x32xbf16>
    %cst_52 = arith.constant dense<0.000000e+00> : vector<128x32xf32>
    %48 = tpu.matmul %26, %47, %cst_52 {dimension_numbers = #tpu.dot_dimension_numbers<[1], [0], [0], [1], [0, 0, 1, 1], [], []>} : vector<128x128xbf16>, vector<128x32xbf16>, vector<128x32xf32> -> vector<128x32xf32>
    %49 = arith.truncf %48 : vector<128x32xf32> to vector<128x32xbf16>
    %c48_53 = arith.constant 48 : index
    %c0_54 = arith.constant 0 : index
    %50 = vector.load %arg3[%c48_53, %c0_54] : memref<144x128xbf16, #tpu.memory_space<vmem>>, vector<32x32xbf16>
    %cst_55 = arith.constant dense<0.000000e+00> : vector<128x32xf32>
    %51 = tpu.matmul %49, %50, %cst_55 {dimension_numbers = #tpu.dot_dimension_numbers<[1], [0], [0], [1], [0, 0, 1, 1], [], []>} : vector<128x32xbf16>, vector<32x32xbf16>, vector<128x32xf32> -> vector<128x32xf32>
    %c16_56 = arith.constant 16 : index
    %c0_57 = arith.constant 0 : index
    %52 = vector.load %arg4[%c16_56, %c0_57] : memref<40x128xf32, #tpu.memory_space<vmem>>, vector<1x32xf32>
    %53 = vector.broadcast %52 : vector<1x32xf32> to vector<128x32xf32>
    %54 = arith.addf %51, %53 : vector<128x32xf32>
    %cst_58 = arith.constant 0.000000e+00 : f32
    %55 = vector.broadcast %cst_58 : f32 to vector<128x32xf32>
    %56 = arith.maximumf %54, %55 : vector<128x32xf32>
    %57 = vector.shape_cast %56 : vector<128x32xf32> to vector<8x16x32xf32>
    %cst_59 = arith.constant dense<0.000000e+00> : vector<8x32xf32>
    %58 = vector.multi_reduction <add>, %57, %cst_59 [1] : vector<8x16x32xf32> to vector<8x32xf32>
    %cst_60 = arith.constant 1.600000e+01 : f32
    %59 = vector.broadcast %cst_60 : f32 to vector<8x32xf32>
    %60 = arith.divf %58, %59 : vector<8x32xf32>
    %61 = arith.truncf %60 : vector<8x32xf32> to vector<8x32xbf16>
    %c80_61 = arith.constant 80 : index
    %c0_62 = arith.constant 0 : index
    %62 = vector.load %arg3[%c80_61, %c0_62] : memref<144x128xbf16, #tpu.memory_space<vmem>>, vector<32x32xbf16>
    %cst_63 = arith.constant dense<0.000000e+00> : vector<8x32xf32>
    %63 = tpu.matmul %61, %62, %cst_63 {dimension_numbers = #tpu.dot_dimension_numbers<[1], [0], [0], [1], [0, 0, 1, 1], [], []>} : vector<8x32xbf16>, vector<32x32xbf16>, vector<8x32xf32> -> vector<8x32xf32>
    %c24 = arith.constant 24 : index
    %c0_64 = arith.constant 0 : index
    %64 = vector.load %arg4[%c24, %c0_64] : memref<40x128xf32, #tpu.memory_space<vmem>>, vector<1x32xf32>
    %65 = vector.broadcast %64 : vector<1x32xf32> to vector<8x32xf32>
    %66 = arith.addf %63, %65 : vector<8x32xf32>
    %cst_65 = arith.constant 0.000000e+00 : f32
    %67 = vector.broadcast %cst_65 : f32 to vector<8x32xf32>
    %68 = arith.maximumf %66, %67 : vector<8x32xf32>
    %69 = arith.truncf %68 : vector<8x32xf32> to vector<8x32xbf16>
    %c112_66 = arith.constant 112 : index
    %c0_67 = arith.constant 0 : index
    %70 = vector.load %arg3[%c112_66, %c0_67] : memref<144x128xbf16, #tpu.memory_space<vmem>>, vector<32x128xbf16>
    %cst_68 = arith.constant dense<0.000000e+00> : vector<8x128xf32>
    %71 = tpu.matmul %69, %70, %cst_68 {dimension_numbers = #tpu.dot_dimension_numbers<[1], [0], [0], [1], [0, 0, 1, 1], [], []>} : vector<8x32xbf16>, vector<32x128xbf16>, vector<8x128xf32> -> vector<8x128xf32>
    %c32_69 = arith.constant 32 : index
    %c0_70 = arith.constant 0 : index
    %72 = vector.load %arg4[%c32_69, %c0_70] : memref<40x128xf32, #tpu.memory_space<vmem>>, vector<1x128xf32>
    %73 = vector.broadcast %72 : vector<1x128xf32> to vector<8x128xf32>
    %74 = arith.addf %71, %73 : vector<8x128xf32>
    %cst_71 = arith.constant dense<0xFF800000> : vector<8xf32>
    %75 = vector.multi_reduction <maximumf>, %74, %cst_71 [1] : vector<8x128xf32> to vector<8xf32>
    %76 = vector.shape_cast %75 : vector<8xf32> to vector<8x1xf32>
    %77 = vector.broadcast %76 : vector<8x1xf32> to vector<8x128xf32>
    %78 = arith.subf %74, %77 : vector<8x128xf32>
    %79 = math.exp %78 : vector<8x128xf32>
    %80 = vector.broadcast %76 : vector<8x1xf32> to vector<8x128xf32>
    %81 = arith.subf %74, %80 : vector<8x128xf32>
    %cst_72 = arith.constant dense<0.000000e+00> : vector<8xf32>
    %82 = vector.multi_reduction <add>, %79, %cst_72 [1] : vector<8x128xf32> to vector<8xf32>
    %83 = vector.shape_cast %82 : vector<8xf32> to vector<8x1xf32>
    %84 = math.log %83 : vector<8x1xf32>
    %85 = vector.broadcast %84 : vector<8x1xf32> to vector<8x128xf32>
    %86 = arith.subf %81, %85 : vector<8x128xf32>
    %c0_73 = arith.constant 0 : index
    %c0_74 = arith.constant 0 : index
    %87 = vector.load %arg5[%c0_73, %c0_74] : memref<8x128xf32, #tpu.memory_space<vmem>>, vector<8x128xf32>
    tpu.vector_store %arg5[%c0_73, %c0_74], %86 {strides = array<i32>} : memref<8x128xf32, #tpu.memory_space<vmem>>, vector<8x128xf32>,
    return
  }
  func.func @transform_0(%arg0: i32) -> (i32, i32, i32, i32) {
    %c0_i32 = arith.constant 0 : i32
    %c0_i32_0 = arith.constant 0 : i32
    %c0_i32_1 = arith.constant 0 : i32
    %c0_i32_2 = arith.constant 0 : i32
    return %arg0, %c0_i32, %c0_i32_0, %c0_i32_1 : i32, i32, i32, i32
  }
  func.func @transform_1(%arg0: i32) -> (i32, i32) {
    %c0_i32 = arith.constant 0 : i32
    %c0_i32_0 = arith.constant 0 : i32
    return %arg0, %c0_i32 : i32, i32
  }
  func.func @transform_2(%arg0: i32) -> (i32, i32) {
    %c0_i32 = arith.constant 0 : i32
    %c0_i32_0 = arith.constant 0 : i32
    %c0_i32_1 = arith.constant 0 : i32
    return %c0_i32, %c0_i32_0 : i32, i32
  }
  func.func @transform_3(%arg0: i32) -> (i32, i32) {
    %c0_i32 = arith.constant 0 : i32
    %c0_i32_0 = arith.constant 0 : i32
    %c0_i32_1 = arith.constant 0 : i32
    return %c0_i32, %c0_i32_0 : i32, i32
  }
  func.func @transform_4(%arg0: i32) -> (i32, i32) {
    %c0_i32 = arith.constant 0 : i32
    %c0_i32_0 = arith.constant 0 : i32
    return %arg0, %c0_i32 : i32, i32
  }
}

</mosaic_0001>

<bundles_post_ra>
// kernel: tpu_custom_call.1
= control target key start
LH: loop header
LB: loop body
LE: loop exit
PB: predicated region body
PF: predicated region fallthrough
CT: control target
= control target key end

     0   :  { %9 = vsyncpa [#allocation4], 0  ;;  %s2512_s0 = inlined_call_operand.vmem [shape: bf16[2,8,16,16], index: 0, kind: input, shape index: {}]   ;;  %s2513_s1 = inlined_call_operand.vmem [shape: bf16[256,8], index: 1, kind: input, shape index: {}]   ;;  %s2514_s2 = inlined_call_operand.hbm [shape: bf16[144,128], index: 2, kind: input, shape index: {}]   ;;  %s2515_s3 = inlined_call_operand.hbm [shape: f32[40,128], index: 3, kind: input, shape index: {}]   ;;  %s2516_s4 = inlined_call_operand.hbm [shape: f32[16,128], index: 4, kind: output, shape index: {}]  }
   0x1   :  { %10 = vsyncpa [#allocation7], 0 }
   0x2   :  { %11 = vsyncpa [#allocation5], 0 }
   0x3   :  { %13 = vsyncpa [#allocation5 + $0x1], 0  ;;  %s2207_s15 = smov 0   ;;  %s2209_s16 = smov 0  }
   0x4   :  { %s2211_s17 = smov 0   ;;  %s2213_s18 = smov 0  }
   0x5 LB: > { %s2228_s19 = sadd.s32 4294967295, %s2163_s18   ;;  %s1594_s20 = sadd.s32 4294967294, %s2163_s18   ;;  %s2163_s18 = sphi %s2213_s18, %s2534_s18   ;;  %s2159_s17 = sphi %s2211_s17, %s2533_s17   ;;  %s2155_s16 = sphi %s2209_s16, %s2532_s16   ;;  %s2151_s15 = sphi %s2207_s15, %s2531_s15  }
   0x6   : > { %s2232_s21 = sadd.s32 1, %s2163_s18   ;;  %s120_s22 = sadd.s32 1, %s2159_s17 }
   0x7   : > { %s117_s23 = ssub.s32 %s2163_s18, %s2232_s21  ;;  %p130_p0 = scmp.ne.s32.totalorder %s2159_s17, %s2155_s16 }
   0x8   : > { %p118_p1 = scmp.eq.s32.totalorder %s117_s23, 0  ;;  %p131_p2 = scmp.eq.s32.totalorder %s2228_s19, 1 }
   0x9   : > { %p136_p3 = scmp.ne.s32.totalorder %s2155_s16, %s2151_s15  ;;  %p137_p4 = scmp.eq.s32.totalorder %s1594_s20, 1 }
   0xa   : > { %s2243_s24 = scalar_select %p118_p1, %s2159_s17, %s120_s22  }
   0xb   : > { %p2245_p5 = por %p131_p2, %p130_p0  ;;  %p2249_p6 = por %p137_p4, %p136_p3 }
   0xc   : > { %p1595_p7 = scmp.ge.s32.totalorder %s2163_s18, 1  ;;  %p144_p8 = scmp.lt.s32.totalorder %s2163_s18, 3 }
   0xd   : > { %s2520_s25 = scalar_select %p2245_p5, 1, 0 }
   0xe   : > { %s2521_s26 = scalar_select %p2249_p6, 1, 0 }
   0xf   : > { %p2517_p9 = scmp.eq.s32.totalorder %s2228_s19, 0  ;;  %p2256_p10 = pnand %p1595_p7, %p144_p8 }
  0x10   : > { %s2165_s28 = smov [#allocation3]   ;;  %s2166_s5 = smov [#allocation6]  }
  0x11   : > { %s2522_s27 = scalar_select %p2256_p10, 1, 0 }
  0x12   : > { %s156_s29 = sshll.u32 %s2165_s28, 4  ;;  %p1945_p11 = pneg %p2256_p10  ;;  %s157_s29 = int_to_ptr.vmem [resolvable:$true] %s156_s29 }
  0x13   : > { %s169_s6 = sshll.u32 %s2166_s5, 4  ;;  %s2037_s9 = scalar_lea.hbm %s2514_s2, 1152  ;;  %s2268_s6 = int_to_ptr.vmem [resolvable:$true] %s169_s6 }
  0x14   : > { %p2264_p12 = pnand %p2517_p9, %p1945_p11  ;;  %p2038_p13 = scmp.ne.s32.totalorder %s2514_s2, %s2037_s9 }
  0x15   : > { %p2044_p3 = scmp.lt.u32.totalorder %s2037_s9, %s2514_s2 }
  0x16   : > { %p2039_p0 = pneg %p2264_p12 }
  0x18   : > { %p2040_p1 = pnand %p2039_p0, %p2038_p13 }
  0x1a   : > { %p2041_p2 = pneg %p2040_p1 }
  0x1c   : > { %p2046_p4 = pnand %p2044_p3, %p2041_p2 }
  0x1e   : > { %2049 = shalt.err (!%p2046_p4)
}
  0x1f   : > { %s2050_s14 = scalar_lea.vmem %s157_s29, 1152  ;;  %p2058_p9 = scmp.lt.s32.totalorder %s157_s29, %s157_s29 }
  0x20   : > { %p2051_p7 = scmp.ne.s32.totalorder %s157_s29, %s2050_s14  ;;  %p2059_p6 = scmp.lt.s32.totalorder %s2050_s14, %s2050_s14 }
  0x22   : > { %p2053_p8 = pnand %p2051_p7, %p2039_p0  ;;  %p2060_p5 = por %p2059_p6, %p2058_p9 }
  0x24   : > { %p2054_p11 = pneg %p2053_p8 }
  0x26   : > { %p2061_p10 = pnand %p2060_p5, %p2054_p11 }
  0x28   : > { %2064 = shalt.err (!%p2061_p10)
}
  0x29   : > { %s2167_s20 = smov 64   ;;  %s2168_s22 = smov 4  }
  0x2a   : > { %1948 = dma.hbm_to_vmem [thread:$0]  (!%p2264_p12), %s2514_s2, 1152, %s157_s29, [#allocation4], %s2167_s20, %s2167_s20, %s2168_s22  }
  0x2b   : > { %s2065_s8 = scalar_lea.hbm %s2515_s3, 640 }
  0x2c   : > { %p2066_p13 = scmp.ne.s32.totalorder %s2515_s3, %s2065_s8  ;;  %p2072_p9 = scmp.lt.u32.totalorder %s2065_s8, %s2515_s3 }
  0x2e   : > { %p2068_p5 = pnand %p2066_p13, %p2039_p0 }
  0x30   : > { %p2069_p6 = pneg %p2068_p5 }
  0x32   : > { %p2074_p10 = pnand %p2072_p9, %p2069_p6 }
  0x34   : > { %2077 = shalt.err (!%p2074_p10)
}
  0x35   : > { %s2078_s29 = scalar_lea.vmem %s2268_s6, 640  ;;  %p2086_p4 = scmp.lt.s32.totalorder %s2268_s6, %s2268_s6 }
  0x36   : > { %p2079_p1 = scmp.ne.s32.totalorder %s2268_s6, %s2078_s29  ;;  %p2087_p7 = scmp.lt.s32.totalorder %s2078_s29, %s2078_s29 }
  0x38   : > { %p2081_p2 = pnand %p2079_p1, %p2039_p0  ;;  %p2088_p8 = por %p2087_p7, %p2086_p4 }
  0x3a   : > { %p2082_p3 = pneg %p2081_p2 }
  0x3c   : > { %p2089_p11 = pnand %p2088_p8, %p2082_p3 }
  0x3e   : > { %2092 = shalt.err (!%p2089_p11)
}
  0x3f   : > { %s2169_s13 = smov 128   ;;  %s2170_s14 = smov 8  }
  0x40   : > { %1951 = dma.hbm_to_vmem [thread:$0]  (!%p2264_p12), %s2515_s3, 640, %s2268_s6, [#allocation7], %s2169_s13, %s2169_s13, %s2170_s14  }
  0x41   : > { %p2524_p13 = scmp.ne.s32.totalorder %s2522_s27, 0 }
  0x42   : > { %p2525_p0 = scmp.eq.s32.totalorder (!%p2524_p13), %s2228_s19, 0 }
  0x43   : > { %202 = sbr.rel (%p2524_p13) target bundleno = 2397 (0x95d), region = 36 }
  0x4a   : > { %2138 = dma.done.wait (%p2525_p0), [#allocation4], 1152   ;;  %p2526_p5 = pmov %p2525_p0 }
  0x4b   : > { %p2527_p6 = pmov %p2525_p0 }
  0x4c   : > { %2140 = vsyncadd (%p2526_p5), [#allocation4], 4294966144 }
  0x4d   : > { %2142 = dma.done.wait (%p2527_p6), [#allocation7], 640   ;;  %p2528_p9 = pmov %p2525_p0 }
  0x4e   : > { %p237_p10 = scmp.lt.s32.totalorder %s2228_s19, 1  ;;  %v2171_v0 = vmov 0   ;;  %s1605_s5 = sshll.u32 %s2228_s19, 4  ;;  %vm265_vm0 = vcmask 130048   ;;  %vm278_vm1 = vcmask 261248   ;;  %vm304_vm2 = vcmask 523648  }
  0x4f   : > { %2144 = vsyncadd (%p2528_p9), [#allocation7], 4294966656  ;;  %250 = vst [vmem:[#allocation2 + $0x8] sm:$0xff] %v2171_v0  ;;  %p243_p12 = scmp.lt.s32.totalorder %s1605_s5, 31  ;;  %s2172_s7 = smov 16   ;;  %vm291_vm3 = vcmask 392448  }
  0x50   : > { %249 = vst [vmem:[#allocation2] sm:$0xff] %v2171_v0  ;;  %251 = vst [vmem:[#allocation2 + $0x10] sm:$0xff] %v2171_v0  ;;  %s238_s27 = scalar_select %p237_p10, %s2228_s19, 1  ;;  %vm317_vm4 = vcmask 654848   ;;  %vm330_vm5 = vcmask 786048   ;;  %vm343_vm6 = vcmask 917248  }
  0x51   : > { %252 = vst [vmem:[#allocation2 + $0x18] sm:$0xff] %v2171_v0  ;;  %253 = vst [vmem:[#allocation2 + $0x20] sm:$0xff] %v2171_v0  ;;  %s2536_s5 = smov (!%p243_p12, %s1605_s5), 31  ;;  %s2173_s8 = smov 48   ;;  %vm356_vm7 = vcmask 1048448   ;;  %vm566_vm8 = vcmask 1043456  }
  0x52   : > { %254 = vst [vmem:[#allocation2 + $0x28] sm:$0xff] %v2171_v0  ;;  %255 = vst [vmem:[#allocation2 + $0x30] sm:$0xff] %v2171_v0  ;;  %s1680_s30 = sshll.u32 %s238_s27, 6  ;;  %s1606_s9 = sshll.u32 %s2536_s5, 2  ;;  %v535_v32 = vld [vmem:[#allocation3] sm:$0xf] }
  0x53   : > { %256 = vst [vmem:[#allocation2 + $0x38] sm:$0xff] %v2171_v0  ;;  %s2332_s28 = scalar_lea.vmem %s2512_s0, %s1680_s30  ;;  %s2343_s12 = scalar_lea.vmem %s2513_s1, %s1606_s9  ;;  %1934 = vmatprep.subr.msk.bf16.mxu1 %vm566_vm8, %v535_v32  ;;  %v568_v33 = vsel %vm566_vm8, %v535_v32, 0  ;;  %vm541_vm9 = vcmask 64512   ;;  %v2025_v58 = vld [vmem:[#allocation3 + $0x8] sm:$0xff]   ;;  %v2026_v59 = vld [vmem:[#allocation3 + $0x10] sm:$0xff]   ;;  %vm817_vm10 = vcmask 261120  }
  0x54   : > { %v2009_v1 = vld [vmem:[%s2332_s28 + $0x8] sm:$0xff]   ;;  %v2010_v2 = vld [vmem:[%s2332_s28 + $0x10] sm:$0xff]   ;;  %v2011_v3 = vld [vmem:[%s2332_s28 + $0x18] sm:$0xff]   ;;  %s2174_s29 = smov 32   ;;  %s2175_s13 = smov 64   ;;  %1797 = vmatpush3.bf16.msra.mxu1 %v568_v33  ;;  %vm2180_vm11 = vmmov 0  }
  0x55   : > { %275 = vrot.lane.b32.xlu0 %v2009_v1, %s2172_s7  ;;  %301 = vrot.lane.b32.xlu1 %v2011_v3, %s2173_s8  ;;  %v2012_v4 = vld [vmem:[%s2332_s28 + $0x20] sm:$0xff]   ;;  %v2013_v5 = vld [vmem:[%s2332_s28 + $0x28] sm:$0xff]   ;;  %s2176_s14 = smov 80   ;;  %s2177_s20 = smov 96   ;;  %vm1340_vm12 = vcmask 1041409   ;;  %vm1342_vm13 = vcmask 1042434  }
  0x56   : > { %v2014_v6 = vld [vmem:[%s2332_s28 + $0x30] sm:$0xff]   ;;  %v2016_v7 = vld [vmem:[%s2343_s12] sm:$0xff]   ;;  %v2017_v8 = vld [vmem:[%s2343_s12 + $0x8] sm:$0xff]   ;;  %s2178_s22 = smov 112   ;;  %vm1344_vm14 = vcmask 1043459   ;;  %vm1346_vm15 = vcmask 1044484  }
  0x57   : > { %1764 = vmatprep.subr.bf16.mxu0 %v2016_v7  ;;  %v2015_v9 = vld [vmem:[%s2332_s28 + $0x38] sm:$0xff]   ;;  %v2018_v10 = vld [vmem:[%s2343_s12 + $0x10] sm:$0xff]   ;;  %v2024_v12 = vld [vmem:[%s2332_s28] sm:$0xff]   ;;  %s234_s27 = sand.u32 1, %s2155_s16   ;;  %s1677_s6 = sshll.u32 %s2228_s19, 7 }
  0x58   : > { %1765 = vmatpush3.bf16.msra.mxu0 %v2016_v7  ;;  %v2019_v11 = vld [vmem:[%s2343_s12 + $0x18] sm:$0xff]   ;;  %v2020_v13 = vld [vmem:[%s2343_s12 + $0x20] sm:$0xff]   ;;  %266 = vst.msk [vmem:[#allocation2] sm:$0xff] %vm265_vm0, %v2024_v12  ;;  %v2021_v14 = vld [vmem:[%s2343_s12 + $0x28] sm:$0xff]   ;;  %vm1348_vm0 = vcmask 1045509   ;;  %s1602_s30 = sshll.u32 %s234_s27, 3  ;;  %s2470_s8 = scalar_lea.hbm %s2516_s4, %s1677_s6 }
  0x59   : > { %288 = vrot.lane.b32.xlu0 %v2010_v2, %s2174_s29  ;;  %314 = vrot.lane.b32.xlu1 %v2012_v4, %s2175_s13  ;;  %v2022_v16 = vld [vmem:[%s2343_s12 + $0x30] sm:$0xff]   ;;  %v2023_v17 = vld [vmem:[%s2343_s12 + $0x38] sm:$0xff]   ;;  %v1637_v60 = vld [vmem:[#allocation6] ss:$0 sm:$0xff]  ;;  %s236_s23 = scalar_lea.vmem [#allocation8], %s1602_s30  ;;  %s1488_s9 = scalar_lea.sflag [#allocation5], %s234_s27 }
  0x5a   : > { %1766 = vmatprep.subr.bf16.mxu0 %v2017_v8  ;;  %s1501_s28 = sshll.u32 %s236_s23, 4  ;;  %p2529_p2 = scmp.ne.s32.totalorder %s2520_s25, 0  ;;  %s2472_s28 = int_to_ptr.vmem [resolvable:$true] %s1501_s28 }
  0x5b   : > { %s2093_s10 = scalar_lea.vmem %s2472_s28, 128  ;;  %s2181_s19 = smov [#allocation8]  }
  0x5c   : > { %1767 = vmatpush3.bf16.msra.mxu0 %v2017_v8  ;;  %p2094_p1 = scmp.ne.s32.totalorder %s2472_s28, %s2093_s10  ;;  %s2097_s11 = sshll.u32 %s2181_s19, 4  ;;  %s2098_s11 = int_to_ptr.vmem [resolvable:$false] %s2097_s11 }
  0x5d   : > { %327 = vrot.lane.b32.xlu0 %v2013_v5, %s2176_s14  ;;  %340 = vrot.lane.b32.xlu1 %v2014_v6, %s2177_s20  ;;  %s2099_s12 = scalar_lea.vmem %s2098_s11, 256  ;;  %p2100_p7 = scmp.lt.s32.totalorder %s2472_s28, %s2098_s11 }
  0x5e   : > { %1768 = vmatprep.subr.bf16.mxu0 %v2018_v10  ;;  %p2095_p3 = pnand %p2094_p1, %p2529_p2  ;;  %p2101_p8 = scmp.lt.s32.totalorder %s2099_s12, %s2093_s10 }
  0x5f   : > { %v2354_v15 = vld [vmem:[#allocation2] sm:$0xff] }
  0x60   : > { %1769 = vmatpush3.bf16.msra.mxu0 %v2018_v10  ;;  %1780 = vmatprep.mubr.bf16.mxu0 %v2354_v15  ;;  %p2096_p4 = pneg %p2095_p3  ;;  %p2102_p11 = por %p2101_p8, %p2100_p7 }
  0x61   : > { %353 = vrot.lane.b32.xlu0 %v2015_v9, %s2178_s22  ;;  %1770 = vmatprep.subr.bf16.mxu0 %v2019_v11 }
  0x62   : > { %p2103_p13 = pnand %p2102_p11, %p2096_p4 }
  0x64   : > { %1771 = vmatpush3.bf16.msra.mxu0 %v2019_v11 }
  0x65   : > { %1772 = vmatprep.subr.bf16.mxu0 %v2020_v13 }
  0x68   : > { %1773 = vmatpush3.bf16.msra.mxu0 %v2020_v13 }
  0x69   : > { %1774 = vmatprep.subr.bf16.mxu0 %v2021_v14 }
  0x6c   : > { %1775 = vmatpush3.bf16.msra.mxu0 %v2021_v14 }
  0x6d   : > { %1776 = vmatprep.subr.bf16.mxu0 %v2022_v16 }
  0x70   : > { %1777 = vmatpush3.bf16.msra.mxu0 %v2022_v16 }
  0x71   : > { %1778 = vmatprep.subr.bf16.mxu0 %v2023_v17 }
  0x74   : > { %1779 = vmatpush3.bf16.msra.mxu0 %v2023_v17 }
  0x75   : > { %1846 = vmatprep.subr.bf16.mxu0 %v2025_v58 }
  0xc7   : > { %v276_v18 = vpop.permute.xlu0 %275  ;;  %v302_v19 = vpop.permute.xlu1 %301 }
  0xc8   : > { %279 = vst.msk [vmem:[#allocation2 + $0x8] sm:$0xff] %vm278_vm1, %v276_v18  ;;  %vm1350_vm1 = vcmask 1046534  }
  0xc9   : > { %305 = vst.msk [vmem:[#allocation2 + $0x18] sm:$0xff] %vm304_vm2, %v302_v19  ;;  %vm1352_vm2 = vcmask 1047559  }
  0xcb   : > { %v289_v20 = vpop.permute.xlu0 %288  ;;  %v315_v21 = vpop.permute.xlu1 %314 }
  0xcc   : > { %292 = vst.msk [vmem:[#allocation2 + $0x10] sm:$0xff] %vm291_vm3, %v289_v20 }
  0xcd   : > { %318 = vst.msk [vmem:[#allocation2 + $0x20] sm:$0xff] %vm317_vm4, %v315_v21 }
  0xcf   : > { %v2359_v22 = vld [vmem:[#allocation2 + $0x8] sm:$0xff]  ;;  %v328_v23 = vpop.permute.xlu0 %327  ;;  %v341_v24 = vpop.permute.xlu1 %340 }
  0xd0   : > { %1781 = vmatmul.mubr.bf16.vlgmr.msra.gmra.mrb[0].mxu0 %v2359_v22  ;;  %331 = vst.msk [vmem:[#allocation2 + $0x28] sm:$0xff] %vm330_vm5, %v328_v23  ;;  %v2365_v27 = vld [vmem:[#allocation2 + $0x18] sm:$0xff] }
  0xd1   : > { %344 = vst.msk [vmem:[#allocation2 + $0x30] sm:$0xff] %vm343_vm6, %v341_v24  ;;  %1847 = vmatpush3.bf16.msra.mxu0 %v2025_v58 }
  0xd2   : > { %1848 = vmatprep.subr.bf16.mxu0 %v2026_v59 }
  0xd3   : > { %v2362_v25 = vld [vmem:[#allocation2 + $0x10] sm:$0xff]  ;;  %v354_v26 = vpop.permute.xlu0 %353 }
  0xd4   : > { %1784 = vmatprep.mubr.bf16.mxu0 %v2362_v25  ;;  %357 = vst.msk [vmem:[#allocation2 + $0x38] sm:$0xff] %vm356_vm7, %v354_v26  ;;  %v2367_v28 = vld [vmem:[#allocation2 + $0x20] sm:$0xff] }
  0xd5   : > { %1849 = vmatpush3.bf16.msra.mxu0 %v2026_v59 }
  0xd7   : > { %v2371_v29 = vld [vmem:[#allocation2 + $0x28] sm:$0xff] }
  0xd8   : > { %1785 = vmatmul.mubr.bf16.gmra.mrb[4].mxu0 %v2365_v27  ;;  %v2373_v30 = vld [vmem:[#allocation2 + $0x30] sm:$0xff] }
  0xd9   : > { %1788 = vmatprep.mubr.bf16.mxu0 %v2367_v28 }
  0xdb   : > { %v2377_v31 = vld [vmem:[#allocation2 + $0x38] sm:$0xff] }
  0xe0   : > { %1789 = vmatmul.mubr.bf16.gmra.mrb[8].mxu0 %v2371_v29 }
  0xe1   : > { %1792 = vmatprep.mubr.bf16.mxu0 %v2373_v30 }
  0xe8   : > { %1793 = vmatmul.mubr.bf16.gmra.mrb[12].mxu0 %v2377_v31 }
 0x1a3   : > { %v1782_v34 = vpop.f32.mrb[0].mxu0 }
 0x1a4   : > { %v464_v35 = vpop.f32.mrb[1].mxu0 }
 0x1a5   : > { %v1783_v36 = vpop.f32.mrb[2].mxu0 }
 0x1a6   : > { %v528_v37 = vpack.c.bf16 %v1783_v36, %v1782_v34  ;;  %v467_v38 = vpop.f32.mrb[3].mxu0 }
 0x1a7   : > { %v527_v39 = vpack.c.bf16 %v467_v38, %v464_v35 }
 0x1a9   : > { %1798 = vmatprep.mubr.msk.bf16.mxu1 %vm541_vm9, %v527_v39 }
 0x1aa   : > { %1799 = vmatmul.mubr.msk.bf16.vlgmr.msra.gmra.mrb[0].mxu1 %vm541_vm9, %v528_v37 }
 0x1ab   : > { %v1786_v40 = vpop.f32.mrb[4].mxu0 }
 0x1ac   : > { %v480_v41 = vpop.f32.mrb[5].mxu0 }
 0x1ad   : > { %v1787_v42 = vpop.f32.mrb[6].mxu0 }
 0x1ae   : > { %v530_v43 = vpack.c.bf16 %v1787_v42, %v1786_v40  ;;  %v483_v44 = vpop.f32.mrb[7].mxu0 }
 0x1af   : > { %v529_v45 = vpack.c.bf16 %v483_v44, %v480_v41 }
 0x1b1   : > { %1802 = vmatprep.mubr.msk.bf16.mxu1 %vm541_vm9, %v529_v45 }
 0x1b2   : > { %1803 = vmatmul.mubr.msk.bf16.gmra.mrb[4].mxu1 %vm541_vm9, %v530_v43 }
 0x1b3   : > { %v1790_v46 = vpop.f32.mrb[8].mxu0 }
 0x1b4   : > { %v496_v47 = vpop.f32.mrb[9].mxu0 }
 0x1b5   : > { %v1791_v48 = vpop.f32.mrb[10].mxu0 }
 0x1b6   : > { %v532_v49 = vpack.c.bf16 %v1791_v48, %v1790_v46  ;;  %v499_v50 = vpop.f32.mrb[11].mxu0 }
 0x1b7   : > { %v531_v51 = vpack.c.bf16 %v499_v50, %v496_v47 }
 0x1b9   : > { %1806 = vmatprep.mubr.msk.bf16.mxu1 %vm541_vm9, %v531_v51 }
 0x1ba   : > { %1807 = vmatmul.mubr.msk.bf16.gmra.mrb[8].mxu1 %vm541_vm9, %v532_v49 }
 0x1bb   : > { %v1794_v52 = vpop.f32.mrb[12].mxu0 }
 0x1bc   : > { %v512_v53 = vpop.f32.mrb[13].mxu0 }
 0x1bd   : > { %v1795_v54 = vpop.f32.mrb[14].mxu0 }
 0x1be   : > { %v534_v55 = vpack.c.bf16 %v1795_v54, %v1794_v52  ;;  %v515_v56 = vpop.f32.mrb[15].mxu0 }
 0x1bf   : > { %v533_v57 = vpack.c.bf16 %v515_v56, %v512_v53 }
 0x1c1   : > { %1810 = vmatprep.mubr.msk.bf16.mxu1 %vm541_vm9, %v533_v57 }
 0x1c2   : > { %1811 = vmatmul.mubr.msk.bf16.gmra.mrb[12].mxu1 %vm541_vm9, %v534_v55 }
 0x1c3   : > { %1830 = vmatprep.mubr.bf16.mxu1 %v2354_v15 }
 0x27d   : > { %v1800_v61 = vpop.f32.mrb[0].mxu1 }
 0x27e   : > { %v613_v62 = vadd.f32 %v1800_v61, %v1637_v60  ;;  %v604_v63 = vpop.f32.mrb[1].mxu1 }
 0x27f   : > { %v605_v0 = vadd.f32 %v1637_v60, %v604_v63  ;;  %v1801_v1 = vpop.f32.mrb[2].mxu1 }
 0x280   : > { %v616_v2 = vadd.f32 %v1801_v1, %v1637_v60  ;;  %v607_v3 = vpop.f32.mrb[3].mxu1  ;;  %v669_v5 = vmax.f32 %v613_v62, 0.0 }
 0x281   : > { %v608_v4 = vadd.f32 %v1637_v60, %v607_v3  ;;  %v667_v7 = vmax.f32 %v605_v0, 0.0 }
 0x282   : > { %v670_v6 = vmax.f32 %v616_v2, 0.0 }
 0x283   : > { %v668_v8 = vmax.f32 %v608_v4, 0.0 }
 0x284   : > { %v684_v9 = vpack.c.bf16 %v670_v6, %v669_v5 }
 0x285   : > { %v683_v10 = vpack.c.bf16 %v668_v8, %v667_v7  ;;  %v1804_v11 = vpop.f32.mrb[4].mxu1 }
 0x286   : > { %v629_v12 = vadd.f32 %v1804_v11, %v1637_v60  ;;  %v620_v13 = vpop.f32.mrb[5].mxu1 }
 0x287   : > { %v621_v14 = vadd.f32 %v1637_v60, %v620_v13  ;;  %v1805_v16 = vpop.f32.mrb[6].mxu1  ;;  %1814 = vmatprep.subr.bf16.mxu1 %v683_v10 }
 0x288   : > { %v632_v17 = vadd.f32 %v1805_v16, %v1637_v60  ;;  %v623_v18 = vpop.f32.mrb[7].mxu1  ;;  %1815 = vmatpush3.bf16.msra.mxu1 %v683_v10  ;;  %v673_v20 = vmax.f32 %v629_v12, 0.0 }
 0x289   : > { %v624_v19 = vadd.f32 %v1637_v60, %v623_v18  ;;  %1816 = vmatprep.subr.bf16.mxu1 %v684_v9  ;;  %v671_v23 = vmax.f32 %v621_v14, 0.0 }
 0x28a   : > { %v674_v21 = vmax.f32 %v632_v17, 0.0 }
 0x28b   : > { %v672_v24 = vmax.f32 %v624_v19, 0.0 }
 0x28c   : > { %v686_v26 = vpack.c.bf16 %v674_v21, %v673_v20  ;;  %1817 = vmatpush3.bf16.msra.mxu1 %v684_v9  ;;  %v2027_v21 = vld [vmem:[#allocation3 + $0x18] sm:$0xff]  }
 0x28d   : > { %v685_v32 = vpack.c.bf16 %v672_v24, %v671_v23  ;;  %v1808_v33 = vpop.f32.mrb[8].mxu1  ;;  %v2028_v23 = vld [vmem:[#allocation3 + $0x20] sm:$0xff]   ;;  %1898 = vmatprep.subr.bf16.mxu0 %v2027_v21  ;;  %v1646_v24 = vld [vmem:[#allocation6 + $0x8] ss:$0 sm:$0xff] }
 0x28e   : > { %v645_v34 = vadd.f32 %v1808_v33, %v1637_v60  ;;  %v636_v35 = vpop.f32.mrb[9].mxu1 }
 0x28f   : > { %v637_v36 = vadd.f32 %v1637_v60, %v636_v35  ;;  %v1809_v37 = vpop.f32.mrb[10].mxu1  ;;  %1818 = vmatprep.subr.bf16.mxu1 %v685_v32 }
 0x290   : > { %v648_v38 = vadd.f32 %v1809_v37, %v1637_v60  ;;  %v639_v39 = vpop.f32.mrb[11].mxu1  ;;  %1819 = vmatpush3.bf16.msra.mxu1 %v685_v32  ;;  %v677_v41 = vmax.f32 %v645_v34, 0.0 }
 0x291   : > { %v640_v40 = vadd.f32 %v1637_v60, %v639_v39  ;;  %1820 = vmatprep.subr.bf16.mxu1 %v686_v26  ;;  %v675_v43 = vmax.f32 %v637_v36, 0.0 }
 0x292   : > { %v678_v42 = vmax.f32 %v648_v38, 0.0 }
 0x293   : > { %v676_v44 = vmax.f32 %v640_v40, 0.0 }
 0x294   : > { %v688_v45 = vpack.c.bf16 %v678_v42, %v677_v41  ;;  %1821 = vmatpush3.bf16.msra.mxu1 %v686_v26 }
 0x295   : > { %v687_v46 = vpack.c.bf16 %v676_v44, %v675_v43  ;;  %v1812_v47 = vpop.f32.mrb[12].mxu1 }
 0x296   : > { %v661_v48 = vadd.f32 %v1812_v47, %v1637_v60  ;;  %v652_v49 = vpop.f32.mrb[13].mxu1 }
 0x297   : > { %v653_v50 = vadd.f32 %v1637_v60, %v652_v49  ;;  %v1813_v51 = vpop.f32.mrb[14].mxu1  ;;  %1822 = vmatprep.subr.bf16.mxu1 %v687_v46 }
 0x298   : > { %v664_v52 = vadd.f32 %v1813_v51, %v1637_v60  ;;  %v655_v53 = vpop.f32.mrb[15].mxu1  ;;  %1823 = vmatpush3.bf16.msra.mxu1 %v687_v46  ;;  %v681_v55 = vmax.f32 %v661_v48, 0.0 }
 0x299   : > { %v656_v54 = vadd.f32 %v1637_v60, %v655_v53  ;;  %1824 = vmatprep.subr.bf16.mxu1 %v688_v45  ;;  %v679_v57 = vmax.f32 %v653_v50, 0.0 }
 0x29a   : > { %v682_v56 = vmax.f32 %v664_v52, 0.0 }
 0x29b   : > { %v680_v58 = vmax.f32 %v656_v54, 0.0 }
 0x29c   : > { %v690_v59 = vpack.c.bf16 %v682_v56, %v681_v55  ;;  %1825 = vmatpush3.bf16.msra.mxu1 %v688_v45 }
 0x29d   : > { %v689_v61 = vpack.c.bf16 %v680_v58, %v679_v57 }
 0x29f   : > { %1826 = vmatprep.subr.bf16.mxu1 %v689_v61 }
 0x2a0   : > { %1827 = vmatpush3.bf16.msra.mxu1 %v689_v61 }
 0x2a1   : > { %1828 = vmatprep.subr.bf16.mxu1 %v690_v59 }
 0x2a4   : > { %1829 = vmatpush3.bf16.msra.mxu1 %v690_v59 }
 0x2a7   : > { %1831 = vmatmul.mubr.bf16.vlgmr.msra.gmra.mrb[16].mxu1 %v2359_v22 }
 0x2a8   : > { %1834 = vmatprep.mubr.bf16.mxu1 %v2362_v25 }
 0x2af   : > { %1835 = vmatmul.mubr.bf16.gmra.mrb[20].mxu1 %v2365_v27 }
 0x2b0   : > { %1838 = vmatprep.mubr.bf16.mxu1 %v2367_v28 }
 0x2b7   : > { %1839 = vmatmul.mubr.bf16.gmra.mrb[24].mxu1 %v2371_v29 }
 0x2b8   : > { %1842 = vmatprep.mubr.bf16.mxu1 %v2373_v30 }
 0x2bf   : > { %1843 = vmatmul.mubr.bf16.gmra.mrb[28].mxu1 %v2377_v31 }
 0x2c0   : > { %1882 = vmatprep.mubr.bf16.mxu1 %v2354_v15 }
 0x37a   : > { %v1832_v60 = vpop.f32.mrb[16].mxu1 }
 0x37b   : > { %v725_v62 = vpop.f32.mrb[17].mxu1 }
 0x37c   : > { %v1833_v63 = vpop.f32.mrb[18].mxu1 }
 0x37d   : > { %v789_v0 = vpack.c.bf16 %v1833_v63, %v1832_v60  ;;  %v728_v1 = vpop.f32.mrb[19].mxu1 }
 0x37e   : > { %v788_v2 = vpack.c.bf16 %v728_v1, %v725_v62 }
 0x380   : > { %1850 = vmatprep.mubr.msk.bf16.mxu0 %vm817_vm10, %v788_v2 }
 0x381   : > { %1851 = vmatmul.mubr.msk.bf16.vlgmr.msra.gmra.mrb[16].mxu0 %vm817_vm10, %v789_v0 }
 0x382   : > { %v1836_v3 = vpop.f32.mrb[20].mxu1  ;;  %1899 = vmatpush3.bf16.msra.mxu0 %v2027_v21 }
 0x383   : > { %v741_v4 = vpop.f32.mrb[21].mxu1  ;;  %1900 = vmatprep.subr.bf16.mxu0 %v2028_v23 }
 0x384   : > { %v1837_v5 = vpop.f32.mrb[22].mxu1 }
 0x385   : > { %v791_v6 = vpack.c.bf16 %v1837_v5, %v1836_v3  ;;  %v744_v7 = vpop.f32.mrb[23].mxu1 }
 0x386   : > { %v790_v8 = vpack.c.bf16 %v744_v7, %v741_v4  ;;  %1901 = vmatpush3.bf16.msra.mxu0 %v2028_v23 }
 0x388   : > { %1854 = vmatprep.mubr.msk.bf16.mxu0 %vm817_vm10, %v790_v8 }
 0x389   : > { %1855 = vmatmul.mubr.msk.bf16.gmra.mrb[20].mxu0 %vm817_vm10, %v791_v6 }
 0x38a   : > { %v1840_v15 = vpop.f32.mrb[24].mxu1 }
 0x38b   : > { %v757_v9 = vpop.f32.mrb[25].mxu1 }
 0x38c   : > { %v1841_v10 = vpop.f32.mrb[26].mxu1 }
 0x38d   : > { %v793_v11 = vpack.c.bf16 %v1841_v10, %v1840_v15  ;;  %v760_v12 = vpop.f32.mrb[27].mxu1 }
 0x38e   : > { %v792_v13 = vpack.c.bf16 %v760_v12, %v757_v9 }
 0x390   : > { %1858 = vmatprep.mubr.msk.bf16.mxu0 %vm817_vm10, %v792_v13 }
 0x391   : > { %1859 = vmatmul.mubr.msk.bf16.gmra.mrb[24].mxu0 %vm817_vm10, %v793_v11 }
 0x392   : > { %v1844_v14 = vpop.f32.mrb[28].mxu1 }
 0x393   : > { %v773_v16 = vpop.f32.mrb[29].mxu1 }
 0x394   : > { %v1845_v17 = vpop.f32.mrb[30].mxu1 }
 0x395   : > { %v795_v18 = vpack.c.bf16 %v1845_v17, %v1844_v14  ;;  %v776_v19 = vpop.f32.mrb[31].mxu1 }
 0x396   : > { %v794_v20 = vpack.c.bf16 %v776_v19, %v773_v16 }
 0x398   : > { %1862 = vmatprep.mubr.msk.bf16.mxu0 %vm817_vm10, %v794_v20 }
 0x399   : > { %1863 = vmatmul.mubr.msk.bf16.gmra.mrb[28].mxu0 %vm817_vm10, %v795_v18 }
 0x454   : > { %v1852_v26 = vpop.f32.mrb[16].mxu0 }
 0x455   : > { %v885_v32 = vadd.f32 %v1852_v26, %v1646_v24  ;;  %v876_v33 = vpop.f32.mrb[17].mxu0 }
 0x456   : > { %v877_v34 = vadd.f32 %v1646_v24, %v876_v33  ;;  %v1853_v35 = vpop.f32.mrb[18].mxu0 }
 0x457   : > { %v888_v36 = vadd.f32 %v1853_v35, %v1646_v24  ;;  %v879_v37 = vpop.f32.mrb[19].mxu0  ;;  %v941_v39 = vmax.f32 %v885_v32, 0.0 }
 0x458   : > { %v880_v38 = vadd.f32 %v1646_v24, %v879_v37  ;;  %v939_v41 = vmax.f32 %v877_v34, 0.0 }
 0x459   : > { %v942_v40 = vmax.f32 %v888_v36, 0.0 }
 0x45a   : > { %v940_v42 = vmax.f32 %v880_v38, 0.0 }
 0x45b   : > { %v956_v43 = vpack.c.bf16 %v942_v40, %v941_v39 }
 0x45c   : > { %v955_v44 = vpack.c.bf16 %v940_v42, %v939_v41  ;;  %v1856_v45 = vpop.f32.mrb[20].mxu0 }
 0x45d   : > { %v901_v46 = vadd.f32 %v1856_v45, %v1646_v24  ;;  %v892_v47 = vpop.f32.mrb[21].mxu0 }
 0x45e   : > { %v893_v48 = vadd.f32 %v1646_v24, %v892_v47  ;;  %v1857_v49 = vpop.f32.mrb[22].mxu0  ;;  %1866 = vmatprep.subr.bf16.mxu1 %v955_v44  ;;  %v2179_v47 = vmov 0.0  }
 0x45f   : > { %v904_v50 = vadd.f32 %v1857_v49, %v1646_v24  ;;  %v895_v51 = vpop.f32.mrb[23].mxu0  ;;  %1867 = vmatpush3.bf16.msra.mxu1 %v955_v44  ;;  %v945_v53 = vmax.f32 %v901_v46, 0.0  ;;  %v2030_v49 = vld [vmem:[#allocation3 + $0x30] sm:$0xff]  }
 0x460   : > { %v896_v52 = vadd.f32 %v1646_v24, %v895_v51  ;;  %1868 = vmatprep.subr.bf16.mxu1 %v956_v43  ;;  %v943_v55 = vmax.f32 %v893_v48, 0.0  ;;  %v2029_v48 = vld [vmem:[#allocation3 + $0x28] sm:$0xff]  }
 0x461   : > { %v946_v54 = vmax.f32 %v904_v50, 0.0  ;;  %v2425_v50 = vld [vmem:[#allocation6 + $0x10] ss:$0 sm:$0xff] }
 0x462   : > { %v944_v56 = vmax.f32 %v896_v52, 0.0 }
 0x463   : > { %v958_v57 = vpack.c.bf16 %v946_v54, %v945_v53  ;;  %1869 = vmatpush3.bf16.msra.mxu1 %v956_v43 }
 0x464   : > { %v957_v58 = vpack.c.bf16 %v944_v56, %v943_v55  ;;  %v1860_v59 = vpop.f32.mrb[24].mxu0 }
 0x465   : > { %v917_v61 = vadd.f32 %v1860_v59, %v1646_v24  ;;  %v908_v60 = vpop.f32.mrb[25].mxu0 }
 0x466   : > { %v909_v62 = vadd.f32 %v1646_v24, %v908_v60  ;;  %v1861_v63 = vpop.f32.mrb[26].mxu0  ;;  %1870 = vmatprep.subr.bf16.mxu1 %v957_v58 }
 0x467   : > { %v920_v0 = vadd.f32 %v1861_v63, %v1646_v24  ;;  %v911_v1 = vpop.f32.mrb[27].mxu0  ;;  %1871 = vmatpush3.bf16.msra.mxu1 %v957_v58  ;;  %v949_v3 = vmax.f32 %v917_v61, 0.0 }
 0x468   : > { %v912_v2 = vadd.f32 %v1646_v24, %v911_v1  ;;  %1872 = vmatprep.subr.bf16.mxu1 %v958_v57  ;;  %v947_v5 = vmax.f32 %v909_v62, 0.0 }
 0x469   : > { %v950_v4 = vmax.f32 %v920_v0, 0.0 }
 0x46a   : > { %v948_v6 = vmax.f32 %v912_v2, 0.0 }
 0x46b   : > { %v960_v7 = vpack.c.bf16 %v950_v4, %v949_v3  ;;  %1873 = vmatpush3.bf16.msra.mxu1 %v958_v57 }
 0x46c   : > { %v959_v8 = vpack.c.bf16 %v948_v6, %v947_v5  ;;  %v1864_v15 = vpop.f32.mrb[28].mxu0 }
 0x46d   : > { %v933_v9 = vadd.f32 %v1864_v15, %v1646_v24  ;;  %v924_v10 = vpop.f32.mrb[29].mxu0 }
 0x46e   : > { %v925_v11 = vadd.f32 %v1646_v24, %v924_v10  ;;  %v1865_v12 = vpop.f32.mrb[30].mxu0  ;;  %1874 = vmatprep.subr.bf16.mxu1 %v959_v8 }
 0x46f   : > { %v936_v13 = vadd.f32 %v1865_v12, %v1646_v24  ;;  %v927_v14 = vpop.f32.mrb[31].mxu0  ;;  %1875 = vmatpush3.bf16.msra.mxu1 %v959_v8  ;;  %v953_v17 = vmax.f32 %v933_v9, 0.0 }
 0x470   : > { %v928_v16 = vadd.f32 %v1646_v24, %v927_v14  ;;  %1876 = vmatprep.subr.bf16.mxu1 %v960_v7  ;;  %v951_v19 = vmax.f32 %v925_v11, 0.0 }
 0x471   : > { %v954_v18 = vmax.f32 %v936_v13, 0.0 }
 0x472   : > { %v952_v20 = vmax.f32 %v928_v16, 0.0 }
 0x473   : > { %v962_v21 = vpack.c.bf16 %v954_v18, %v953_v17  ;;  %1877 = vmatpush3.bf16.msra.mxu1 %v960_v7 }
 0x474   : > { %v961_v23 = vpack.c.bf16 %v952_v20, %v951_v19 }
 0x476   : > { %1878 = vmatprep.subr.bf16.mxu1 %v961_v23 }
 0x477   : > { %1879 = vmatpush3.bf16.msra.mxu1 %v961_v23 }
 0x478   : > { %1880 = vmatprep.subr.bf16.mxu1 %v962_v21 }
 0x47b   : > { %1881 = vmatpush3.bf16.msra.mxu1 %v962_v21 }
 0x47c   : > { %1918 = vmatprep.subr.bf16.mxu1 %v2179_v47 }
 0x47e   : > { %1883 = vmatmul.mubr.bf16.vlgmr.msra.gmra.mrb[32].mxu1 %v2359_v22 }
 0x47f   : > { %1886 = vmatprep.mubr.bf16.mxu1 %v2362_v25  ;;  %1919 = vmatpush3.bf16.msra.mxu1 %v2029_v48 }
 0x480   : > { %1920 = vmatprep.subr.bf16.mxu1 %v2179_v47 }
 0x483   : > { %1921 = vmatpush3.bf16.msra.mxu1 %v2030_v49 }
 0x484   : > { %1926 = vmatprep.subr.bf16.mxu1 %v2179_v47 }
 0x486   : > { %1887 = vmatmul.mubr.bf16.gmra.mrb[36].mxu1 %v2365_v27 }
 0x487   : > { %1890 = vmatprep.mubr.bf16.mxu1 %v2367_v28 }
 0x48e   : > { %1891 = vmatmul.mubr.bf16.gmra.mrb[40].mxu1 %v2371_v29 }
 0x48f   : > { %1894 = vmatprep.mubr.bf16.mxu1 %v2373_v30 }
 0x496   : > { %1895 = vmatmul.mubr.bf16.gmra.mrb[44].mxu1 %v2377_v31 }
 0x497   : > { %1922 = vmatprep.mubr.msk.bf16.mxu1 %vm2180_vm11, %v2179_v47 }
 0x551   : > { %v1884_v24 = vpop.f32.mrb[32].mxu1 }
 0x552   : > { %v997_v26 = vpop.f32.mrb[33].mxu1 }
 0x553   : > { %v1885_v32 = vpop.f32.mrb[34].mxu1 }
 0x554   : > { %v1061_v33 = vpack.c.bf16 %v1885_v32, %v1884_v24  ;;  %v1000_v34 = vpop.f32.mrb[35].mxu1 }
 0x555   : > { %v1060_v35 = vpack.c.bf16 %v1000_v34, %v997_v26 }
 0x557   : > { %1902 = vmatprep.mubr.msk.bf16.mxu0 %vm817_vm10, %v1060_v35 }
 0x558   : > { %1903 = vmatmul.mubr.msk.bf16.vlgmr.msra.gmra.mrb[32].mxu0 %vm817_vm10, %v1061_v33 }
 0x559   : > { %v1888_v22 = vpop.f32.mrb[36].mxu1 }
 0x55a   : > { %v1013_v25 = vpop.f32.mrb[37].mxu1 }
 0x55b   : > { %v1889_v27 = vpop.f32.mrb[38].mxu1 }
 0x55c   : > { %v1063_v28 = vpack.c.bf16 %v1889_v27, %v1888_v22  ;;  %v1016_v36 = vpop.f32.mrb[39].mxu1 }
 0x55d   : > { %v1062_v29 = vpack.c.bf16 %v1016_v36, %v1013_v25 }
 0x55f   : > { %1906 = vmatprep.mubr.msk.bf16.mxu0 %vm817_vm10, %v1062_v29 }
 0x560   : > { %1907 = vmatmul.mubr.msk.bf16.gmra.mrb[36].mxu0 %vm817_vm10, %v1063_v28 }
 0x561   : > { %v1892_v30 = vpop.f32.mrb[40].mxu1 }
 0x562   : > { %v1029_v31 = vpop.f32.mrb[41].mxu1 }
 0x563   : > { %v1893_v37 = vpop.f32.mrb[42].mxu1 }
 0x564   : > { %v1065_v38 = vpack.c.bf16 %v1893_v37, %v1892_v30  ;;  %v1032_v39 = vpop.f32.mrb[43].mxu1 }
 0x565   : > { %v1064_v40 = vpack.c.bf16 %v1032_v39, %v1029_v31 }
 0x567   : > { %1910 = vmatprep.mubr.msk.bf16.mxu0 %vm817_vm10, %v1064_v40 }
 0x568   : > { %1911 = vmatmul.mubr.msk.bf16.gmra.mrb[40].mxu0 %vm817_vm10, %v1065_v38 }
 0x569   : > { %v1896_v41 = vpop.f32.mrb[44].mxu1 }
 0x56a   : > { %v1045_v42 = vpop.f32.mrb[45].mxu1 }
 0x56b   : > { %v1897_v43 = vpop.f32.mrb[46].mxu1 }
 0x56c   : > { %v1067_v44 = vpack.c.bf16 %v1897_v43, %v1896_v41  ;;  %v1048_v45 = vpop.f32.mrb[47].mxu1 }
 0x56d   : > { %v1066_v46 = vpack.c.bf16 %v1048_v45, %v1045_v42 }
 0x56f   : > { %1914 = vmatprep.mubr.msk.bf16.mxu0 %vm817_vm10, %v1066_v46 }
 0x570   : > { %1915 = vmatmul.mubr.msk.bf16.gmra.mrb[44].mxu0 %vm817_vm10, %v1067_v44 }
 0x62b   : > { %v1904_v51 = vpop.f32.mrb[32].mxu0 }
 0x62c   : > { %v1156_v52 = vadd.f32 %v1904_v51, %v2425_v50  ;;  %v1147_v53 = vpop.f32.mrb[33].mxu0 }
 0x62d   : > { %v1148_v54 = vadd.f32 %v2425_v50, %v1147_v53  ;;  %v1905_v55 = vpop.f32.mrb[34].mxu0 }
 0x62e   : > { %v1212_v56 = vmax.f32 %v1156_v52, 0.0  ;;  %v1159_v57 = vadd.f32 %v1905_v55, %v2425_v50  ;;  %v1150_v58 = vpop.f32.mrb[35].mxu0 }
 0x62f   : > { %v1210_v59 = vmax.f32 %v1148_v54, 0.0  ;;  %v1151_v61 = vadd.f32 %v2425_v50, %v1150_v58 }
 0x630   : > { %v1213_v60 = vmax.f32 %v1159_v57, 0.0  ;;  %v1235_v63 = vsel %vm817_vm10, %v1212_v56, 0.0 }
 0x631   : > { %v1211_v62 = vmax.f32 %v1151_v61, 0.0  ;;  %v1226_v1 = vsel %vm817_vm10, %v1210_v59, 0.0 }
 0x632   : > { %v1236_v0 = vsel %vm817_vm10, %v1213_v60, 0.0 }
 0x633   : > { %v1237_v2 = vadd.f32 %v1236_v0, %v1235_v63  ;;  %v1227_v3 = vsel %vm817_vm10, %v1211_v62, 0.0  ;;  %v1908_v4 = vpop.f32.mrb[36].mxu0 }
 0x634   : > { %v1228_v5 = vadd.f32 %v1227_v3, %v1226_v1  ;;  %v1172_v6 = vadd.f32 %v1908_v4, %v2425_v50  ;;  %v1163_v7 = vpop.f32.mrb[37].mxu0 }
 0x635   : > { %v1238_v8 = vrot.slane %v1237_v2, 4  ;;  %v1164_v15 = vadd.f32 %v2425_v50, %v1163_v7  ;;  %v1909_v9 = vpop.f32.mrb[38].mxu0 }
 0x636   : > { %v1229_v10 = vrot.slane %v1228_v5, 4  ;;  %v1216_v11 = vmax.f32 %v1172_v6, 0.0  ;;  %v1175_v12 = vadd.f32 %v1909_v9, %v2425_v50  ;;  %v1166_v13 = vpop.f32.mrb[39].mxu0 }
 0x637   : > { %v1239_v14 = vadd.f32 %v1238_v8, %v1237_v2  ;;  %v1214_v16 = vmax.f32 %v1164_v15, 0.0  ;;  %v1167_v17 = vadd.f32 %v2425_v50, %v1166_v13 }
 0x638   : > { %v1230_v18 = vadd.f32 %v1229_v10, %v1228_v5  ;;  %v1217_v19 = vmax.f32 %v1175_v12, 0.0  ;;  %v1253_v24 = vsel %vm817_vm10, %v1216_v11, 0.0 }
 0x639   : > { %v1240_v20 = vrot.slane %v1239_v14, 2  ;;  %v1215_v21 = vmax.f32 %v1167_v17, 0.0  ;;  %v1244_v33 = vsel %vm817_vm10, %v1214_v16, 0.0 }
 0x63a   : > { %v1231_v23 = vrot.slane %v1230_v18, 2  ;;  %v1254_v26 = vsel %vm817_vm10, %v1217_v19, 0.0 }
 0x63b   : > { %v1241_v32 = vadd.f32 %v1240_v20, %v1239_v14  ;;  %v1255_v34 = vadd.f32 %v1254_v26, %v1253_v24  ;;  %v1245_v35 = vsel %vm817_vm10, %v1215_v21, 0.0  ;;  %v1912_v22 = vpop.f32.mrb[40].mxu0 }
 0x63c   : > { %v1232_v25 = vadd.f32 %v1231_v23, %v1230_v18  ;;  %v1246_v27 = vadd.f32 %v1245_v35, %v1244_v33  ;;  %v1188_v28 = vadd.f32 %v1912_v22, %v2425_v50  ;;  %v1179_v36 = vpop.f32.mrb[41].mxu0 }
 0x63d   : > { %v1242_v29 = vrot.slane %v1241_v32, 1  ;;  %v1256_v30 = vrot.slane %v1255_v34, 4  ;;  %v1180_v31 = vadd.f32 %v2425_v50, %v1179_v36  ;;  %v1913_v37 = vpop.f32.mrb[42].mxu0 }
 0x63e   : > { %v1233_v38 = vrot.slane %v1232_v25, 1  ;;  %v1247_v39 = vrot.slane %v1246_v27, 4  ;;  %v1220_v40 = vmax.f32 %v1188_v28, 0.0  ;;  %v1191_v41 = vadd.f32 %v1913_v37, %v2425_v50  ;;  %v1182_v42 = vpop.f32.mrb[43].mxu0 }
 0x63f   : > { %v1243_v43 = vadd.f32 %v1242_v29, %v1241_v32  ;;  %v1257_v44 = vadd.f32 %v1256_v30, %v1255_v34  ;;  %v1218_v45 = vmax.f32 %v1180_v31, 0.0  ;;  %v1183_v46 = vadd.f32 %v2425_v50, %v1182_v42 }
 0x640   : > { %v1234_v48 = vadd.f32 %v1233_v38, %v1232_v25  ;;  %v1248_v49 = vadd.f32 %v1247_v39, %v1246_v27  ;;  %v1221_v51 = vmax.f32 %v1191_v41, 0.0  ;;  %v1271_v54 = vsel %vm817_vm10, %v1220_v40, 0.0 }
 0x641   : > { %v1300_v52 = vmul.f32 0.0625, %v1243_v43  ;;  %v1258_v53 = vrot.slane %v1257_v44, 2  ;;  %v1219_v55 = vmax.f32 %v1183_v46, 0.0  ;;  %v1262_v58 = vsel %vm817_vm10, %v1218_v45, 0.0 }
 0x642   : > { %v1299_v56 = vmul.f32 0.0625, %v1234_v48  ;;  %v1249_v57 = vrot.slane %v1248_v49, 2  ;;  %v1272_v59 = vsel %vm817_vm10, %v1221_v51, 0.0 }
 0x643   : > { %v1308_v61 = vpack.c.bf16 %v1300_v52, %v1300_v52  ;;  %v1259_v60 = vadd.f32 %v1258_v53, %v1257_v44  ;;  %v1273_v62 = vadd.f32 %v1272_v59, %v1271_v54  ;;  %v1263_v63 = vsel %vm817_vm10, %v1219_v55, 0.0  ;;  %v1916_v0 = vpop.f32.mrb[44].mxu0 }
 0x644   : > { %v1307_v1 = vpack.c.bf16 %v1299_v56, %v1299_v56  ;;  %v1250_v2 = vadd.f32 %v1249_v57, %v1248_v49  ;;  %v1264_v3 = vadd.f32 %v1263_v63, %v1262_v58  ;;  %v1204_v4 = vadd.f32 %v1916_v0, %v2425_v50  ;;  %v1195_v5 = vpop.f32.mrb[45].mxu0 }
 0x645   : > { %v1333_v6 = vunpack.c.l.b16 %v1308_v61  ;;  %v1260_v7 = vrot.slane %v1259_v60, 1  ;;  %v1274_v8 = vrot.slane %v1273_v62, 4  ;;  %v1196_v15 = vadd.f32 %v2425_v50, %v1195_v5  ;;  %v1917_v9 = vpop.f32.mrb[46].mxu0 }
 0x646   : > { %v1332_v10 = vunpack.c.l.b16 %v1307_v1  ;;  %v1251_v11 = vrot.slane %v1250_v2, 1  ;;  %v1265_v12 = vrot.slane %v1264_v3, 4  ;;  %v1198_v13 = vpop.f32.mrb[47].mxu0  ;;  %v1224_v17 = vmax.f32 %v1204_v4, 0.0 }
 0x647   : > { %v1261_v14 = vadd.f32 %v1260_v7, %v1259_v60  ;;  %v1275_v16 = vadd.f32 %v1274_v8, %v1273_v62  ;;  %v1207_v18 = vadd.f32 %v1917_v9, %v2425_v50  ;;  %v1222_v26 = vmax.f32 %v1196_v15, 0.0 }
 0x648   : > { %v1341_v19 = vsel %vm1340_vm12, %v1333_v6, %v1332_v10  ;;  %v1252_v20 = vadd.f32 %v1251_v11, %v1250_v2  ;;  %v1266_v21 = vadd.f32 %v1265_v12, %v1264_v3  ;;  %v1199_v35 = vadd.f32 %v2425_v50, %v1198_v13  ;;  %v2031_v13 = vld [vmem:[#allocation3 + $0x38] sm:$0xff]  }
 0x649   : > { %v1302_v23 = vmul.f32 0.0625, %v1261_v14  ;;  %v1276_v24 = vrot.slane %v1275_v16, 2  ;;  %v1225_v32 = vmax.f32 %v1207_v18, 0.0  ;;  %v1289_v27 = vsel %vm817_vm10, %v1224_v17, 0.0  ;;  %v2032_v14 = vld [vmem:[#allocation3 + $0x40] sm:$0xff]  }
 0x64a   : > { %v1301_v33 = vmul.f32 0.0625, %v1252_v20  ;;  %v1267_v34 = vrot.slane %v1266_v21, 2  ;;  %v1223_v31 = vmax.f32 %v1199_v35, 0.0  ;;  %v1280_v38 = vsel %vm817_vm10, %v1222_v26, 0.0  ;;  %v1672_v26 = vld [vmem:[#allocation6 + $0x20] ss:$0 sm:$0xff] }
 0x64b   : > { %v1310_v22 = vpack.c.bf16 %v1302_v23, %v1302_v23  ;;  %v1277_v25 = vadd.f32 %v1276_v24, %v1275_v16  ;;  %v1290_v28 = vsel %vm817_vm10, %v1225_v32, 0.0  ;;  %v1668_v16 = vld [vmem:[#allocation6 + $0x18] ss:$0 sm:$0xff] }
 0x64c   : > { %v1309_v36 = vpack.c.bf16 %v1301_v33, %v1301_v33  ;;  %v1268_v29 = vadd.f32 %v1267_v34, %v1266_v21  ;;  %v1291_v30 = vadd.f32 %v1290_v28, %v1289_v27  ;;  %v1281_v50 = vsel %vm817_vm10, %v1223_v31, 0.0 }
 0x64d   : > { %v1278_v37 = vrot.slane %v1277_v25, 1  ;;  %v1335_v42 = vunpack.c.l.b16 %v1310_v22  ;;  %v1282_v44 = vadd.f32 %v1281_v50, %v1280_v38 }
 0x64e   : > { %v1334_v39 = vunpack.c.l.b16 %v1309_v36  ;;  %v1269_v40 = vrot.slane %v1268_v29, 1  ;;  %v1292_v41 = vrot.slane %v1291_v30, 4 }
 0x64f   : > { %v1279_v43 = vadd.f32 %v1278_v37, %v1277_v25  ;;  %v1283_v52 = vrot.slane %v1282_v44, 4 }
 0x650   : > { %v1343_v45 = vsel %vm1342_vm13, %v1334_v39, %v1341_v19  ;;  %v1270_v46 = vadd.f32 %v1269_v40, %v1268_v29  ;;  %v1293_v48 = vadd.f32 %v1292_v41, %v1291_v30 }
 0x651   : > { %v1304_v49 = vmul.f32 0.0625, %v1279_v43  ;;  %v1345_v51 = vsel %vm1344_vm14, %v1335_v42, %v1343_v45  ;;  %v1284_v56 = vadd.f32 %v1283_v52, %v1282_v44 }
 0x652   : > { %v1303_v53 = vmul.f32 0.0625, %v1270_v46  ;;  %v1294_v54 = vrot.slane %v1293_v48, 2 }
 0x653   : > { %v1312_v55 = vpack.c.bf16 %v1304_v49, %v1304_v49  ;;  %v1285_v59 = vrot.slane %v1284_v56, 2 }
 0x654   : > { %v1311_v57 = vpack.c.bf16 %v1303_v53, %v1303_v53  ;;  %v1295_v58 = vadd.f32 %v1294_v54, %v1293_v48 }
 0x655   : > { %v1337_v62 = vunpack.c.l.b16 %v1312_v55  ;;  %v1286_v63 = vadd.f32 %v1285_v59, %v1284_v56 }
 0x656   : > { %v1336_v61 = vunpack.c.l.b16 %v1311_v57  ;;  %v1296_v60 = vrot.slane %v1295_v58, 1 }
 0x657   : > { %v1287_v2 = vrot.slane %v1286_v63, 1 }
 0x658   : > { %v1347_v0 = vsel %vm1346_vm15, %v1336_v61, %v1345_v51  ;;  %v1297_v1 = vadd.f32 %v1296_v60, %v1295_v58 }
 0x659   : > { %v1349_v3 = vsel %vm1348_vm0, %v1337_v62, %v1347_v0  ;;  %v1288_v5 = vadd.f32 %v1287_v2, %v1286_v63 }
 0x65a   : > { %v1306_v4 = vmul.f32 0.0625, %v1297_v1 }
 0x65b   : > { %v1305_v6 = vmul.f32 0.0625, %v1288_v5 }
 0x65c   : > { %v1314_v7 = vpack.c.bf16 %v1306_v4, %v1306_v4 }
 0x65d   : > { %v1313_v8 = vpack.c.bf16 %v1305_v6, %v1305_v6 }
 0x65e   : > { %v1339_v9 = vunpack.c.l.b16 %v1314_v7 }
 0x65f   : > { %v1338_v15 = vunpack.c.l.b16 %v1313_v8 }
 0x661   : > { %v1351_v10 = vsel %vm1350_vm1, %v1338_v15, %v1349_v3 }
 0x662   : > { %v1353_v11 = vsel %vm1352_vm2, %v1339_v9, %v1351_v10 }
 0x663   : > { %v1354_v12 = vpack.c.b16 %v1353_v11, %v1353_v11 }
 0x665   : > { %1923 = vmatmul.mubr.msk.bf16.vlgmr.msra.gmra.mrb[48].mxu1 %vm817_vm10, %v1354_v12 }
 0x666   : > { %1930 = vmatprep.mubr.msk.bf16.mxu1 %vm2180_vm11, %v2179_v47  ;;  %1927 = vmatpush3.bf16.msra.mxu1 %v2031_v13 }
 0x667   : > { %1928 = vmatprep.subr.bf16.mxu1 %v2179_v47 }
 0x66a   : > { %1929 = vmatpush3.bf16.msra.mxu1 %v2032_v14 }
 0x738   : > { %v1404_v17 = vpop.f32.mrb[48].mxu1 }
 0x739   : > { %v1405_v18 = vadd.f32 %v1668_v16, %v1404_v17  ;;  %v1924_v19 = vpop.f32.mrb[49].mxu1 }
 0x73a   : > { %v1407_v20 = vpop.f32.mrb[50].mxu1 }
 0x73b   : > { %v1410_v21 = vmax.f32 %v1405_v18, 0.0  ;;  %v1925_v23 = vpop.f32.mrb[51].mxu1 }
 0x73d   : > { %v1411_v24 = vpack.c.bf16 %v1410_v21, %v1410_v21 }
 0x73f   : > { %1931 = vmatmul.mubr.msk.bf16.vlgmr.msra.gmra.mrb[52].mxu1 %vm817_vm10, %v1411_v24 }
 0x812   : > { %v1470_v32 = vpop.f32.mrb[52].mxu1 }
 0x813   : > { %v1471_v33 = vadd.f32 %v1672_v26, %v1470_v32  ;;  %v1932_v34 = vpop.f32.mrb[53].mxu1 }
 0x814   : > { %v1473_v35 = vpop.f32.mrb[54].mxu1 }
 0x815   : > { %1476 = vmax.xlane.f32.xlu1 %v1471_v33  ;;  %v1933_v47 = vpop.f32.mrb[55].mxu1 }
 0x8a2   : > { %v1477_v22 = vpop.xlane.xlu1 %1476 }
 0x8a3   : > { %v1478_v25 = vsub.f32 %v1471_v33, %v1477_v22 }
 0x8a5   : > { %v1479_v27 = vmul.f32 1.442695, %v1478_v25 }
 0x8a7   : > { %2033 = vpow2.f32 %v1479_v27 }
 0x8b1   : > { %v2034_v28 = vpop.eup %2033 }
 0x8b2   : > { %1481 = vadd.xlane.f32.xlu0 %v2034_v28 }
 0x93f   : > { %v1482_v36 = vpop.xlane.xlu0 %1481 }
 0x940   : > { %2035 = vlog2.f32 %v1482_v36 }
 0x94a   : > { %v2036_v29 = vpop.eup %2035 }
 0x94b   : > { %v1484_v30 = vmul.f32 0.6931472, %v2036_v29 }
 0x94d   : > { %v1485_v31 = vsub.f32 %v1478_v25, %v1484_v30 }
 0x94f   : > { %1486 = vst [vmem:[%s236_s23] sm:$0xff] %v1485_v31 }
 0x950   : > { %2106 = shalt.err (!%p2103_p13)
}
 0x951   : > { %s2107_s29 = scalar_lea.hbm %s2470_s8, 128  ;;  %s2111_s20 = scalar_lea.hbm %s2516_s4, 256 }
 0x952   : > { %p2108_p0 = scmp.ne.s32.totalorder %s2470_s8, %s2107_s29  ;;  %p2112_p9 = scmp.lt.u32.totalorder %s2470_s8, %s2516_s4 }
 0x953   : > { %p2113_p10 = scmp.lt.u32.totalorder %s2111_s20, %s2107_s29  ;;  %p2115_p1 = scmp.lt.u32.totalorder %s2107_s29, %s2470_s8 }
 0x954   : > { %p2109_p5 = pnand %p2108_p0, %p2529_p2 }
 0x955   : > { %p2114_p12 = por %p2113_p10, %p2112_p9 }
 0x956   : > { %p2110_p6 = pneg %p2109_p5 }
 0x957   : > { %p2116_p3 = por %p2115_p1, %p2114_p12 }
 0x959   : > { %p2117_p4 = pnand %p2116_p3, %p2110_p6 }
 0x95b   : > { %2120 = shalt.err (!%p2117_p4)
}
 0x95c   : > { %1943 = dma.vmem_to_hbm [thread:$0]  (%p2529_p2), %s2472_s28, 128, %s2470_s8, %s1488_s9  }
 0x95d PF: > { %p1960_p7 = scmp.ge.s32.totalorder %s2163_s18, 2  ;;  %s1513_s30 = sand.u32 1, %s2151_s15  }
 0x95e   : > { %p2530_p8 = scmp.ne.s32.totalorder %s2521_s26, 0  ;;  %s1514_s6 = scalar_lea.sflag [#allocation5], %s1513_s30 }
 0x960   : > { %p1953_p11 = pnand %p1960_p7, %p2530_p8 }
 0x962   : > { %2146 = dma.done.wait (!%p1953_p11), %s1514_s6, 128  }
 0x963   : > { %2148 = vsyncadd (!%p1953_p11), %s1514_s6, 4294967168  ;;  %p16_p13 = scmp.ge.s32.totalorder %s2232_s21, 4   ;;  %s2531_s15 = smov %s2155_s16 }
 0x964   : > { %s2532_s16 = smov %s2159_s17  ;;  %s2533_s17 = smov %s2243_s24 }
 0x965   : > { %s2534_s18 = smov %s2232_s21  ;;  %18 = sbr.rel (!%p16_p13) target bundleno = 5 (0x5), region = 90 }
 0x96c   :  { %1519 = vsyncpa [#allocation4], 1 }
 0x96d   :  { %1521 = vsyncpa [#allocation4 + $0x1], 1 }
 0x96e   :  { %1522 = vsyncpa [#allocation7], 1 }
 0x96f   :  { %1523 = vsyncpa [#allocation5], 1 }
 0x970   :  { %1525 = vsyncpa [#allocation5 + $0x1], 1 }

</bundles_post_ra>
